<compile_context>
chip_gen: v6e
topology: v6e:2x2x1
jax: 0.10.0
libtpu: 0.0.40
codegen_flags: <defaults>
</compile_context>

<pallas_src>
import functools

import jax
import jax.numpy as jnp
from jax import lax
from jax.experimental import pallas as pl
from jax.experimental.pallas import tpu as pltpu


def mlp_softmax_kernel(x_ref, w1_ref, b1_ref, w2_ref, b2_ref, o_ref,
                       *, total_rows, tile_b):
    # Hidden layer: (TILE_B, obs) @ (obs, H) on the MXU, f32 accumulation.
    # Cast to the weight dtype in-kernel (free VPU op) so x can stream as f32.
    x = x_ref[...].astype(w1_ref.dtype)
    h = jnp.dot(x, w1_ref[...], preferred_element_type=jnp.float32)
    h = jnp.maximum(h + b1_ref[...], 0.0)               # bias + ReLU in f32 (VPU)

    # Output layer: (TILE_B, H) @ (H, A).
    logits = jnp.dot(h.astype(w2_ref.dtype), w2_ref[...],
                     preferred_element_type=jnp.float32)
    logits = logits + b2_ref[...]

    # Ragged last tile: rows >= total_rows hold undefined data; force them to a
    # finite value so exp/softmax stays NaN-free (their outputs are dropped anyway).
    if total_rows % tile_b != 0:
        row = (pl.program_id(0) * tile_b
               + lax.broadcasted_iota(jnp.int32, logits.shape, 0))
        logits = jnp.where(row < total_rows, logits, 0.0)

    # Numerically-stable softmax over the last axis (PyTorch dim=1 for 2-D input).
    m = jnp.max(logits, axis=-1, keepdims=True)
    e = jnp.exp(logits - m)
    denom = jnp.sum(e, axis=-1, keepdims=True)
    o_ref[...] = (e / denom).astype(o_ref.dtype)        # exact divide: rows sum to 1


def _round_up(n, m):
    return ((n + m - 1) // m) * m


def net_forward(x, w1, b1, w2, b2, *, tile_b=2048, mxu_dtype=None):
    """x: (B, obs), w1: (obs, H), b1: (1, H), w2: (H, A), b2: (1, A) -> (B, A) f32.

    tile_b:    batch rows per grid step (rounded to a multiple of 8). Large tiles
               amortize the fixed per-grid-step pipeline overhead.
    mxu_dtype: optionally cast the (tiny) weights to e.g. jnp.bfloat16; x is cast
               in-kernel, so no extra HBM pass.  In a real training loop this cast
               would be hoisted to parameter creation.
    """
    B, obs = x.shape
    H = w1.shape[1]
    A = w2.shape[1]

    if mxu_dtype is not None:
        w1 = w1.astype(mxu_dtype)
        w2 = w2.astype(mxu_dtype)
    b1 = b1.astype(jnp.float32)
    b2 = b2.astype(jnp.float32)

    # Tile selection: multiple of 8 (sublane); shrink to the batch for tiny B;
    # split so the grid has >=2 steps (v7x megacore) when B is in (tile_b, 2*tile_b).
    tile_b = max(8, _round_up(tile_b, 8))
    if B <= tile_b:
        tile_b = _round_up(B, 8)
    elif B < 2 * tile_b:
        tile_b = _round_up(pl.cdiv(B, 2), 8)
    grid = (pl.cdiv(B, tile_b),)

    kernel = functools.partial(mlp_softmax_kernel, total_rows=B, tile_b=tile_b)

    out = pl.pallas_call(
        kernel,
        out_shape=jax.ShapeDtypeStruct((B, A), jnp.float32),
        grid_spec=pltpu.PrefetchScalarGridSpec(
            num_scalar_prefetch=0,
            grid=grid,
            in_specs=[
                # Streamed per-tile input (double-buffered by the pipeline).
                pl.BlockSpec((tile_b, obs), lambda i: (i, 0)),
                # Grid-invariant (VMEM-resident) weights and biases (~10 KB total).
                pl.BlockSpec((obs, H), lambda i: (0, 0)),
                pl.BlockSpec((1, H), lambda i: (0, 0)),
                pl.BlockSpec((H, A), lambda i: (0, 0)),
                pl.BlockSpec((1, A), lambda i: (0, 0)),
            ],
            out_specs=pl.BlockSpec((tile_b, A), lambda i: (i, 0)),
        ),
        compiler_params=pltpu.CompilerParams(
            dimension_semantics=("parallel",),  # batch tiles are independent
        ),
    )(x, w1, b1, w2, b2)

    return out


def init_params(key, obs_size, hidden_size, n_actions):
    """Deterministic init mimicking nn.Linear's uniform(-1/sqrt(fan_in), 1/sqrt(fan_in))."""
    k1, k2, k3, k4 = jax.random.split(key, 4)
    bound1 = 1.0 / jnp.sqrt(obs_size)
    bound2 = 1.0 / jnp.sqrt(hidden_size)
    w1 = jax.random.uniform(k1, (obs_size, hidden_size), jnp.float32, -bound1, bound1)
    b1 = jax.random.uniform(k2, (1, hidden_size), jnp.float32, -bound1, bound1)
    w2 = jax.random.uniform(k3, (hidden_size, n_actions), jnp.float32, -bound2, bound2)
    b2 = jax.random.uniform(k4, (1, n_actions), jnp.float32, -bound2, bound2)
    return w1, b1, w2, b2


def _reference(x, w1, b1, w2, b2):
    h = jnp.maximum(x @ w1 + b1, 0.0)
    return jax.nn.softmax(h @ w2 + b2, axis=1)


if __name__ == "__main__":
    obs_size, hidden_size, n_actions = 32, 64, 8

    key = jax.random.PRNGKey(0)
    kx1, kx2, kp = jax.random.split(key, 3)
    w1, b1, w2, b2 = init_params(kp, obs_size, hidden_size, n_actions)

    # Case 1: tiny batch (single grid step, tile shrinks to the batch, no masking).
    x_small = jax.random.normal(kx1, (8, obs_size), jnp.float32)
    out_small = jax.block_until_ready(net_forward(x_small, w1, b1, w2, b2))
    ref_small = _reference(x_small, w1, b1, w2, b2)
    assert out_small.shape == (8, n_actions)
    assert jnp.allclose(out_small, ref_small, atol=2e-3, rtol=2e-3)
    assert jnp.allclose(jnp.sum(out_small, axis=1), 1.0, atol=2e-3)

    # Case 2: multi-step grid with a ragged (masked) last tile, no padding pass.
    x_big = jax.random.normal(kx2, (300, obs_size), jnp.float32)
    out_big = jax.block_until_ready(net_forward(x_big, w1, b1, w2, b2, tile_b=128))
    ref_big = _reference(x_big, w1, b1, w2, b2)
    assert out_big.shape == (300, n_actions)
    assert jnp.allclose(out_big, ref_big, atol=2e-3, rtol=2e-3)
    assert jnp.allclose(jnp.sum(out_big, axis=1), 1.0, atol=2e-3)

    # Case 3: bf16 MXU operands (weights only; x is cast in-kernel, no extra HBM pass).
    out_bf16 = jax.block_until_ready(
        net_forward(x_big, w1, b1, w2, b2, tile_b=128, mxu_dtype=jnp.bfloat16))
    assert out_bf16.shape == (300, n_actions)
    assert jnp.allclose(out_bf16, ref_big, atol=5e-2)
    assert jnp.allclose(jnp.sum(out_bf16, axis=1), 1.0, atol=2e-3)

    print("KERNEL_OK")
</pallas_src>

<mosaic_0001>
module attributes {stable_mosaic.version = 11 : i64} {
  func.func @mlp_softmax_kernel(%arg0: i32, %arg1: memref<8x32xf32, #tpu.memory_space<vmem>>, %arg2: memref<32x64xf32, #tpu.memory_space<vmem>>, %arg3: memref<1x64xf32, #tpu.memory_space<vmem>>, %arg4: memref<64x8xf32, #tpu.memory_space<vmem>>, %arg5: memref<1x8xf32, #tpu.memory_space<vmem>>, %arg6: memref<8x8xf32, #tpu.memory_space<vmem>>) attributes {dimension_semantics = [#tpu.dimension_semantics<parallel>], iteration_bounds = array<i64: 1>, scalar_prefetch = 0 : i64, scratch_operands = 0 : i64, tpu.core_type = #tpu.core_type<tc>, window_params = [{transform_indices = @transform_0, window_bounds = array<i64: 8, 32>}, {pipeline_mode = #tpu.pipeline_mode<synchronous>, transform_indices = @transform_1, window_bounds = array<i64: 32, 64>}, {pipeline_mode = #tpu.pipeline_mode<synchronous>, transform_indices = @transform_2, window_bounds = array<i64: 1, 64>}, {pipeline_mode = #tpu.pipeline_mode<synchronous>, transform_indices = @transform_3, window_bounds = array<i64: 64, 8>}, {pipeline_mode = #tpu.pipeline_mode<synchronous>, transform_indices = @transform_4, window_bounds = array<i64: 1, 8>}, {transform_indices = @transform_5, window_bounds = array<i64: 8, 8>}]} {
    %c0 = arith.constant 0 : index
    %c0_0 = arith.constant 0 : index
    %0 = vector.load %arg1[%c0, %c0_0] : memref<8x32xf32, #tpu.memory_space<vmem>>, vector<8x32xf32>
    %c0_1 = arith.constant 0 : index
    %c0_2 = arith.constant 0 : index
    %1 = vector.load %arg2[%c0_1, %c0_2] : memref<32x64xf32, #tpu.memory_space<vmem>>, vector<32x64xf32>
    %cst = arith.constant dense<0.000000e+00> : vector<8x64xf32>
    %2 = tpu.matmul %0, %1, %cst {dimension_numbers = #tpu.dot_dimension_numbers<[1], [0], [0], [1], [0, 0, 1, 1], [], []>} : vector<8x32xf32>, vector<32x64xf32>, vector<8x64xf32> -> vector<8x64xf32>
    %c0_3 = arith.constant 0 : index
    %c0_4 = arith.constant 0 : index
    %3 = vector.load %arg3[%c0_3, %c0_4] : memref<1x64xf32, #tpu.memory_space<vmem>>, vector<1x64xf32>
    %4 = vector.broadcast %3 : vector<1x64xf32> to vector<8x64xf32>
    %5 = arith.addf %2, %4 : vector<8x64xf32>
    %cst_5 = arith.constant 0.000000e+00 : f32
    %6 = vector.broadcast %cst_5 : f32 to vector<8x64xf32>
    %7 = arith.maximumf %5, %6 : vector<8x64xf32>
    %c0_6 = arith.constant 0 : index
    %c0_7 = arith.constant 0 : index
    %8 = vector.load %arg4[%c0_6, %c0_7] : memref<64x8xf32, #tpu.memory_space<vmem>>, vector<64x8xf32>
    %cst_8 = arith.constant dense<0.000000e+00> : vector<8x8xf32>
    %9 = tpu.matmul %7, %8, %cst_8 {dimension_numbers = #tpu.dot_dimension_numbers<[1], [0], [0], [1], [0, 0, 1, 1], [], []>} : vector<8x64xf32>, vector<64x8xf32>, vector<8x8xf32> -> vector<8x8xf32>
    %c0_9 = arith.constant 0 : index
    %c0_10 = arith.constant 0 : index
    %10 = vector.load %arg5[%c0_9, %c0_10] : memref<1x8xf32, #tpu.memory_space<vmem>>, vector<1x8xf32>
    %11 = vector.broadcast %10 : vector<1x8xf32> to vector<8x8xf32>
    %12 = arith.addf %9, %11 : vector<8x8xf32>
    %cst_11 = arith.constant dense<0xFF800000> : vector<8xf32>
    %13 = vector.multi_reduction <maximumf>, %12, %cst_11 [1] : vector<8x8xf32> to vector<8xf32>
    %14 = vector.shape_cast %13 : vector<8xf32> to vector<8x1xf32>
    %15 = vector.broadcast %14 : vector<8x1xf32> to vector<8x8xf32>
    %16 = arith.subf %12, %15 : vector<8x8xf32>
    %17 = math.exp %16 : vector<8x8xf32>
    %cst_12 = arith.constant dense<0.000000e+00> : vector<8xf32>
    %18 = vector.multi_reduction <add>, %17, %cst_12 [1] : vector<8x8xf32> to vector<8xf32>
    %19 = vector.shape_cast %18 : vector<8xf32> to vector<8x1xf32>
    %20 = vector.broadcast %19 : vector<8x1xf32> to vector<8x8xf32>
    %21 = arith.divf %17, %20 : vector<8x8xf32>
    %c0_13 = arith.constant 0 : index
    %c0_14 = arith.constant 0 : index
    %22 = vector.load %arg6[%c0_13, %c0_14] : memref<8x8xf32, #tpu.memory_space<vmem>>, vector<8x8xf32>
    tpu.vector_store %arg6[%c0_13, %c0_14], %21 {strides = array<i32>} : memref<8x8xf32, #tpu.memory_space<vmem>>, vector<8x8xf32>,
    return
  }
  func.func @transform_0(%arg0: i32) -> (i32, i32) {
    %c0_i32 = arith.constant 0 : i32
    %c0_i32_0 = arith.constant 0 : i32
    return %arg0, %c0_i32 : i32, i32
  }
  func.func @transform_1(%arg0: i32) -> (i32, i32) {
    %c0_i32 = arith.constant 0 : i32
    %c0_i32_0 = arith.constant 0 : i32
    %c0_i32_1 = arith.constant 0 : i32
    return %c0_i32, %c0_i32_0 : i32, i32
  }
  func.func @transform_2(%arg0: i32) -> (i32, i32) {
    %c0_i32 = arith.constant 0 : i32
    %c0_i32_0 = arith.constant 0 : i32
    %c0_i32_1 = arith.constant 0 : i32
    return %c0_i32, %c0_i32_0 : i32, i32
  }
  func.func @transform_3(%arg0: i32) -> (i32, i32) {
    %c0_i32 = arith.constant 0 : i32
    %c0_i32_0 = arith.constant 0 : i32
    %c0_i32_1 = arith.constant 0 : i32
    return %c0_i32, %c0_i32_0 : i32, i32
  }
  func.func @transform_4(%arg0: i32) -> (i32, i32) {
    %c0_i32 = arith.constant 0 : i32
    %c0_i32_0 = arith.constant 0 : i32
    %c0_i32_1 = arith.constant 0 : i32
    return %c0_i32, %c0_i32_0 : i32, i32
  }
  func.func @transform_5(%arg0: i32) -> (i32, i32) {
    %c0_i32 = arith.constant 0 : i32
    %c0_i32_0 = arith.constant 0 : i32
    return %arg0, %c0_i32 : i32, i32
  }
}

</mosaic_0001>

<bundles_post_ra>
// kernel: tpu_custom_call.1
= control target key start
LH: loop header
LB: loop body
LE: loop exit
PB: predicated region body
PF: predicated region fallthrough
CT: control target
= control target key end

     0   :  { %v301_v1 = vmov 0.0   ;;  %vm302_vm0 = vmmov 0   ;;  %s387_s0 = inlined_call_operand.vmem [shape: f32[8,32], index: 0, kind: input, shape index: {}]   ;;  %s388_s1 = inlined_call_operand.vmem [shape: f32[32,64], index: 1, kind: input, shape index: {}]   ;;  %s389_s2 = inlined_call_operand.vmem [shape: f32[1,64], index: 2, kind: input, shape index: {}]   ;;  %s390_s3 = inlined_call_operand.vmem [shape: f32[64,8], index: 3, kind: input, shape index: {}]   ;;  %s391_s4 = inlined_call_operand.vmem [shape: f32[1,8], index: 4, kind: input, shape index: {}]   ;;  %s392_s5 = inlined_call_operand.hbm [shape: f32[8,8], index: 5, kind: output, shape index: {}]  }
   0x1   :  { %v25_v0 = vld [vmem:[%s388_s1 + $0x18] sm:$0xff]  ;;  %242 = vmatprep.subr.mxu0 %v301_v1  ;;  %v24_v2 = vld [vmem:[%s388_s1 + $0x10] sm:$0xff]  ;;  %250 = vmatprep.mubr.msk.f32.mxu0 %vm302_vm0, %v301_v1  ;;  %v23_v5 = vld [vmem:[%s388_s1 + $0x8] sm:$0xff] }
   0x2   :  { %v115_v3 = vld [vmem:[%s390_s3 + $0x38] sm:$0xff]  ;;  %243 = vmatpush3.msra.mxu0 %v25_v0  ;;  %253 = vmatprep.subr.mxu1 %v301_v1  ;;  %v114_v4 = vld [vmem:[%s390_s3 + $0x30] sm:$0xff] }
   0x3   :  { %244 = vmatprep.subr.mxu0 %v301_v1  ;;  %254 = vmatpush3.msra.mxu1 %v115_v3 }
   0x4   :  { %10 = vsyncpa [#allocation3], 0  ;;  %245 = vmatpush3.msra.mxu0 %v24_v2  ;;  %255 = vmatprep.subr.mxu1 %v301_v1  ;;  %v113_v6 = vld [vmem:[%s390_s3 + $0x28] sm:$0xff]  ;;  %v22_v7 = vld [vmem:[%s388_s1] sm:$0xff]  ;;  %vm33_vm1 = vcmask 261120   ;;  %vm123_vm2 = vcmask 523264  }
   0x5   :  { %246 = vmatprep.subr.mxu0 %v301_v1  ;;  %256 = vmatpush3.msra.mxu1 %v114_v4  ;;  %v21_v8 = vld [vmem:[%s387_s0] sm:$0xff]  ;;  %v111_v10 = vld [vmem:[%s390_s3 + $0x18] sm:$0xff]  ;;  %v110_v11 = vld [vmem:[%s390_s3 + $0x10] sm:$0xff]  ;;  %vm197_vm3 = vcmask 64512  }
   0x6   :  { %247 = vmatpush3.msra.mxu0 %v23_v5  ;;  %257 = vmatprep.subr.mxu1 %v301_v1  ;;  %v112_v9 = vld [vmem:[%s390_s3 + $0x20] sm:$0xff]  ;;  %v109_v12 = vld [vmem:[%s390_s3 + $0x8] sm:$0xff] }
   0x7   :  { %248 = vmatprep.subr.mxu0 %v301_v1  ;;  %258 = vmatpush3.msra.mxu1 %v113_v6  ;;  %v108_v13 = vld [vmem:[%s390_s3] sm:$0xff] }
   0x8   :  { %249 = vmatpush3.msra.mxu0 %v22_v7  ;;  %259 = vmatprep.subr.mxu1 %v301_v1  ;;  %v224_v14 = vld [vmem:[%s389_s2] ss:$0 sm:$0xff]  ;;  %s303_s2 = smov [#allocation2]  }
   0x9   :  { %251 = vmatmul.mubr.msk.f32.vlgmr.msra.gmra.mxu0 %vm33_vm1, %v21_v8  ;;  %260 = vmatpush3.msra.mxu1 %v112_v9  ;;  %v226_v19 = vld [vmem:[%s391_s4] ss:$0 sm:$0xff]  ;;  %s216_s3 = sshll.u32 %s303_s2, 4  ;;  %s217_s3 = int_to_ptr.vmem [resolvable:$true] %s216_s3 }
   0xa   :  { %261 = vmatprep.subr.mxu1 %v301_v1  ;;  %269 = vmatprep.mubr.msk.f32.mxu1 %vm302_vm0, %v301_v1  ;;  %s279_s4 = scalar_lea.vmem %s217_s3, 128  ;;  %p284_p1 = scmp.lt.s32.totalorder %s217_s3, %s217_s3 }
   0xb   :  { %262 = vmatpush3.msra.mxu1 %v111_v10  ;;  %p280_p0 = scmp.ne.s32.totalorder %s217_s3, %s279_s4  ;;  %p285_p2 = scmp.lt.s32.totalorder %s279_s4, %s279_s4 }
   0xc   :  { %263 = vmatprep.subr.mxu1 %v301_v1 }
   0xd   :  { %264 = vmatpush3.msra.mxu1 %v110_v11  ;;  %p286_p3 = por %p285_p2, %p284_p1 }
   0xe   :  { %265 = vmatprep.subr.mxu1 %v301_v1 }
   0xf   :  { %266 = vmatpush3.msra.mxu1 %v109_v12  ;;  %p287_p4 = pnand %p286_p3, %p280_p0 }
  0x10   :  { %267 = vmatprep.subr.mxu1 %v301_v1 }
  0x11   :  { %268 = vmatpush3.msra.mxu1 %v108_v13 }
  0xc9   :  { %v103_v15 = vpop.f32.mrf.mxu0 }
  0xca   :  { %v104_v16 = vadd.f32 %v224_v14, %v103_v15 }
  0xcb   :  { %v252_v17 = vpop.f32.mrf.mxu0 }
  0xcc   :  { %v107_v18 = vmax.f32 %v104_v16, 0.0 }
  0xce   :  { %270 = vmatmul.mubr.msk.f32.vlgmr.msra.gmra.mxu1 %vm123_vm2, %v107_v18 }
 0x18e   :  { %v193_v20 = vpop.f32.mrf.mxu1 }
 0x18f   :  { %v194_v21 = vadd.f32 %v226_v19, %v193_v20 }
 0x190   :  { %v271_v22 = vpop.f32.mrf.mxu1 }
 0x191   :  { %v198_v23 = vsel %vm197_vm3, %v194_v21, -inf }
 0x192   :  { %199 = vmax.xlane.f32.xlu0 %v198_v23 }
 0x21b   :  { %v200_v24 = vpop.xlane.xlu0 %199 }
 0x21c   :  { %v201_v25 = vsub.f32 %v194_v21, %v200_v24 }
 0x21e   :  { %v202_v26 = vmul.f32 1.442695, %v201_v25 }
 0x220   :  { %275 = vpow2.f32 %v202_v26 }
 0x22d   :  { %v276_v27 = vpop.eup %275 }
 0x22e   :  { %v204_v28 = vsel %vm197_vm3, %v276_v27, 0.0 }
 0x22f   :  { %205 = vadd.xlane.f32.xlu0 %v204_v28 }
 0x2b8   :  { %v206_v29 = vpop.xlane.xlu0 %205 }
 0x2b9   :  { %277 = vrcp.f32 %v206_v29 }
 0x2c6   :  { %v278_v30 = vpop.eup %277 }
 0x2c7   :  { %v208_v31 = vmul.f32 %v278_v30, %v276_v27 }
 0x2c9   :  { %209 = vst.msk [vmem:[#allocation2] sm:$0xff] %vm197_vm3, %v208_v31 }
 0x2ca   :  { %290 = shalt.err (!%p287_p4)
}
 0x2cb   :  { %219 = dma.vmem_to_hbm [thread:$0]  %s217_s3, 128, %s392_s5, [#allocation3]  }
 0x2cc   :  { %299 = dma.done.wait [#allocation3], 128  }
 0x2cd   :  { %300 = vsyncadd [#allocation3], 4294967168 }
 0x2ce   :  { %223 = vsyncpa [#allocation3], 1 }

</bundles_post_ra>
